<compile_context>
chip_gen: v5e
topology: v5e:2x2
jax: 0.10.0
libtpu: 0.0.40
codegen_flags: <defaults>
</compile_context>

<pallas_src>
import functools

import jax
import jax.numpy as jnp
from jax.experimental import pallas as pl
from jax.experimental.pallas import tpu as pltpu


_LANE = 128
_DEFAULT_COLS = 1024  # lane-dense: large multiple of 128 -> unmasked full-width stores


def _cdiv(a, b):
    return -(-a // b)


def _round_up(a, b):
    return _cdiv(a, b) * b


@functools.lru_cache(maxsize=1)
def _tpu_generation():
    """Best-effort generation sniff. Returns (is_v7_two_tc, force_f32_compute)."""
    kind = ""
    try:
        kind = jax.devices()[0].device_kind.lower()
    except Exception:  # non-TPU / exotic runtimes: fall back to safe defaults
        pass
    is_v7 = "v7" in kind
    # v6e / v7x have bf16 VPU + EUP; v5e (and anything unknown) computes in f32.
    has_bf16_vpu = ("v6" in kind) or is_v7
    return is_v7, not has_bf16_vpu


def _sublane_multiple(dtype):
    # Native sublane tile: f32 -> 8, bf16 -> 16, int8/fp8 -> 32.
    return max(8, 32 // jnp.dtype(dtype).itemsize)


def _silu_kernel(x_ref, o_ref, *, compute_dtype):
    x = x_ref[...].astype(compute_dtype)
    # silu(x) = x * sigmoid(x) = x / (1 + exp(-x)).
    # exp lands in the EUP slot; approx reciprocal avoids the Newton-refined
    # divide so the whole chain stays hidden under the streaming DMA.
    z = jnp.exp(-x)
    o_ref[...] = (x * pl.reciprocal(1.0 + z, approx=True)).astype(o_ref.dtype)


def silu_pallas(x, *, target_tile_bytes=None):
    """SiLU over an arbitrary-shape array via a tiled, lane-dense Pallas kernel."""
    orig_shape = x.shape
    dtype = x.dtype
    n = x.size
    if n == 0:
        return x

    itemsize = jnp.dtype(dtype).itemsize
    sublane = _sublane_multiple(dtype)
    is_v7, force_f32 = _tpu_generation()

    if target_tile_bytes is None:
        # ~8 MiB tiles on v7x (amortize per-step overhead against 3.2 TB/s HBM),
        # ~4 MiB on v5e/v6e.  Double-buffered in+out footprint <= 32 MiB.
        target_tile_bytes = (8 if is_v7 else 4) * 1024 * 1024

    # ---- lane-dense 2D layout, avoiding extra HBM passes whenever possible ----
    cols = None
    for c in (_DEFAULT_COLS, 512, 256, _LANE):
        if n % c == 0:
            cols = c
            break
    needs_pad = cols is None
    if needs_pad:
        # Unaligned flat size: zero-pad the tail (silu(0) == 0), slice afterwards.
        cols = _DEFAULT_COLS
        padded_n = _round_up(n, cols)
        x2d = jnp.pad(jnp.ravel(x), (0, padded_n - n)).reshape(padded_n // cols, cols)
    else:
        # Free reshape: just collapse dims; no pad / no output slice.
        x2d = jnp.reshape(x, (n // cols, cols))
    rows = x2d.shape[0]

    # ---- block rows: keep the tile ~target_tile_bytes regardless of dtype ----
    block_rows = max(sublane, (target_tile_bytes // (cols * itemsize)) // sublane * sublane)
    if block_rows >= rows:
        block_rows = rows  # single block == full array dims (always legal)
    # On the 2-TensorCore v7x, prefer >= 4 grid steps (2 per core) so both cores
    # get work and each keeps a double-buffered pipeline.  Skip on 1-TC parts.
    if is_v7 and rows >= 4 * 256 and _cdiv(rows, block_rows) < 4:
        cand = max(256, _round_up(_cdiv(rows, 4), sublane))
        if cand < block_rows:
            block_rows = cand

    grid = (_cdiv(rows, block_rows),)

    if dtype == jnp.bfloat16 and not force_f32:
        compute_dtype = jnp.bfloat16  # v6e/v7x: bf16 VPU + EUP
    else:
        compute_dtype = jnp.float32   # v5e / unknown / f32 inputs

    out2d = pl.pallas_call(
        functools.partial(_silu_kernel, compute_dtype=compute_dtype),
        out_shape=jax.ShapeDtypeStruct((rows, cols), dtype),
        grid_spec=pltpu.PrefetchScalarGridSpec(
            num_scalar_prefetch=0,
            grid=grid,
            in_specs=[pl.BlockSpec((block_rows, cols), lambda i: (i, 0))],
            out_specs=pl.BlockSpec((block_rows, cols), lambda i: (i, 0)),
        ),
        compiler_params=pltpu.CompilerParams(
            dimension_semantics=("parallel",),
            vmem_limit_bytes=48 * 1024 * 1024,
        ),
        cost_estimate=pl.CostEstimate(
            flops=4 * rows * cols,
            transcendentals=2 * rows * cols,
            bytes_accessed=2 * rows * cols * itemsize,
        ),
    )(x2d)

    if needs_pad:
        return jnp.reshape(out2d, (-1,))[:n].reshape(orig_shape)
    return jnp.reshape(out2d, orig_shape)


def _silu_ref(x):
    xf = x.astype(jnp.float32)
    return (xf * jax.nn.sigmoid(xf)).astype(x.dtype)


if __name__ == "__main__":
    key = jax.random.PRNGKey(0)

    # Shape consistent with a typical NCHW activation tensor (aligned fast path).
    x = jax.random.normal(key, (2, 4, 16, 16), dtype=jnp.float32)
    y = silu_pallas(x)
    jax.block_until_ready(y)
    assert y.shape == x.shape and y.dtype == x.dtype
    # Tolerance accommodates the approximate EUP reciprocal in the kernel.
    assert jnp.allclose(y, _silu_ref(x), atol=1e-2, rtol=1e-2)

    # Unaligned flat size -> exercises the jnp.pad fallback path.
    x2 = jax.random.normal(jax.random.PRNGKey(1), (3, 7, 33, 65), dtype=jnp.float32)
    y2 = silu_pallas(x2)
    jax.block_until_ready(y2)
    assert jnp.allclose(y2, _silu_ref(x2), atol=1e-2, rtol=1e-2)

    # bf16 path (bf16 compute on v6e/v7x, f32 upcast on v5e).
    x3 = jax.random.normal(jax.random.PRNGKey(2), (2, 8, 256), dtype=jnp.bfloat16)
    y3 = silu_pallas(x3)
    jax.block_until_ready(y3)
    assert y3.dtype == jnp.bfloat16
    assert jnp.allclose(y3.astype(jnp.float32), _silu_ref(x3).astype(jnp.float32),
                        atol=5e-2, rtol=5e-2)

    # Ragged last row-block (rows not a multiple of block_rows, no padding):
    # Pallas masks the out-of-bounds stores of the last block.
    x4 = jax.random.normal(jax.random.PRNGKey(3), (41, 256), dtype=jnp.float32)
    y4 = silu_pallas(x4, target_tile_bytes=16 * 1024)
    jax.block_until_ready(y4)
    assert jnp.allclose(y4, _silu_ref(x4), atol=1e-2, rtol=1e-2)

    print("KERNEL_OK")
</pallas_src>

<mosaic_0001>
module attributes {stable_mosaic.version = 11 : i64} {
  func.func @_silu_kernel(%arg0: i32, %arg1: memref<2x1024xf32, #tpu.memory_space<vmem>>, %arg2: memref<2x1024xf32, #tpu.memory_space<vmem>>) attributes {dimension_semantics = [#tpu.dimension_semantics<parallel>], iteration_bounds = array<i64: 1>, scalar_prefetch = 0 : i64, scratch_operands = 0 : i64, tpu.core_type = #tpu.core_type<tc>, window_params = [{transform_indices = @transform_0, window_bounds = array<i64: 2, 1024>}, {transform_indices = @transform_1, window_bounds = array<i64: 2, 1024>}]} {
    %c0 = arith.constant 0 : index
    %c0_0 = arith.constant 0 : index
    %0 = vector.load %arg1[%c0, %c0_0] : memref<2x1024xf32, #tpu.memory_space<vmem>>, vector<2x1024xf32>
    %cst = arith.constant 0.000000e+00 : f32
    %1 = vector.broadcast %cst : f32 to vector<2x1024xf32>
    %2 = arith.subf %1, %0 : vector<2x1024xf32>
    %3 = math.exp %2 : vector<2x1024xf32>
    %cst_1 = arith.constant 1.000000e+00 : f32
    %4 = vector.broadcast %cst_1 : f32 to vector<2x1024xf32>
    %5 = arith.addf %4, %3 : vector<2x1024xf32>
    %6 = tpu.reciprocal %5 {approx = true} : vector<2x1024xf32> -> vector<2x1024xf32>
    %7 = arith.mulf %0, %6 : vector<2x1024xf32>
    %c0_2 = arith.constant 0 : index
    %c0_3 = arith.constant 0 : index
    %8 = vector.load %arg2[%c0_2, %c0_3] : memref<2x1024xf32, #tpu.memory_space<vmem>>, vector<2x1024xf32>
    tpu.vector_store %arg2[%c0_2, %c0_3], %7 {strides = array<i32>} : memref<2x1024xf32, #tpu.memory_space<vmem>>, vector<2x1024xf32>,
    return
  }
  func.func @transform_0(%arg0: i32) -> (i32, i32) {
    %c0_i32 = arith.constant 0 : i32
    %c0_i32_0 = arith.constant 0 : i32
    return %arg0, %c0_i32 : i32, i32
  }
  func.func @transform_1(%arg0: i32) -> (i32, i32) {
    %c0_i32 = arith.constant 0 : i32
    %c0_i32_0 = arith.constant 0 : i32
    return %arg0, %c0_i32 : i32, i32
  }
}

</mosaic_0001>

<bundles_post_ra>
// kernel: tpu_custom_call.1
= control target key start
LH: loop header
LB: loop body
LE: loop exit
PB: predicated region body
PF: predicated region fallthrough
CT: control target
= control target key end

     0   :  { %6 = vsyncpa [#allocation3], 0  ;;  %s136_s0 = inlined_call_operand.hbm [shape: f32[2,1024], index: 0, kind: input, shape index: {}]   ;;  %s137_s1 = inlined_call_operand.hbm [shape: f32[2,1024], index: 1, kind: output, shape index: {}]  }
   0x1   :  { %7 = vsyncpa [#allocation4], 0  ;;  %s13_s8 = sshll.u32 %s136_s0, 4  ;;  %s118_s9 = smov [#allocation2]   ;;  %s14_s8 = int_to_ptr.hbm [resolvable:$true] %s13_s8 }
   0x2   :  { %s15_s10 = sshll.u32 %s118_s9, 4  ;;  %s16_s10 = int_to_ptr.vmem [resolvable:$true] %s15_s10 }
   0x3   :  { %18 = dma.hbm_to_vmem [thread:$0]  %s14_s8, 256, %s16_s10, [#allocation3]  }
   0x4   :  { %114 = dma.done.wait [#allocation3], 256  }
   0x5   :  { %115 = vsyncadd [#allocation3], 4294967040  ;;  %v23_v0 = vld [vmem:[#allocation2] sm:$0xff]  ;;  %v24_v1 = vld [vmem:[#allocation2 + $0x8] sm:$0xff]  ;;  %s119_s0 = smov [#allocation5]   ;;  %s46_s14 = sshll.u32 %s137_s1, 4  ;;  %s47_s14 = int_to_ptr.hbm [resolvable:$true] %s46_s14 }
   0x6   :  { %v25_v2 = vsub.f32 0.0, %v23_v0  ;;  %v26_v3 = vsub.f32 0.0, %v24_v1  ;;  %s44_s11 = sshll.u32 %s119_s0, 4  ;;  %s45_s11 = int_to_ptr.vmem [resolvable:$true] %s44_s11 }
   0x8   :  { %v27_v4 = vmul.f32 1.442695, %v25_v2  ;;  %v29_v5 = vmul.f32 1.442695, %v26_v3 }
   0xa   :  { %58 = vpow2.f32 %v27_v4 }
   0xb   :  { %60 = vpow2.f32 %v29_v5 }
  0x10   :  { %v59_v6 = vpop.eup %58 }
  0x11   :  { %v61_v7 = vpop.eup %60  ;;  %v31_v8 = vadd.f32 1.0, %v59_v6 }
  0x12   :  { %v32_v9 = vadd.f32 1.0, %v61_v7 }
  0x13   :  { %62 = vrcp.f32 %v31_v8 }
  0x14   :  { %64 = vrcp.f32 %v32_v9 }
  0x19   :  { %v63_v10 = vpop.eup %62 }
  0x1a   :  { %v65_v11 = vpop.eup %64  ;;  %v35_v12 = vmul.f32 %v63_v10, %v23_v0 }
  0x1b   :  { %v36_v13 = vmul.f32 %v65_v11, %v24_v1 }
  0x1c   :  { %37 = vst [vmem:[#allocation5] sm:$0xff] %v35_v12 }
  0x1d   :  { %38 = vst [vmem:[#allocation5 + $0x8] sm:$0xff] %v36_v13 }
  0x1e   :  { %49 = dma.vmem_to_hbm [thread:$0]  %s45_s11, 256, %s47_s14, [#allocation4]  }
  0x1f   :  { %116 = dma.done.wait [#allocation4], 256  }
  0x20   :  { %117 = vsyncadd [#allocation4], 4294967040 }
  0x21   :  { %54 = vsyncpa [#allocation3], 1 }
  0x22   :  { %55 = vsyncpa [#allocation4], 1 }

</bundles_post_ra>
